<compile_context>
chip_gen: v6e
topology: v6e:2x2x1
jax: 0.10.0
libtpu: 0.0.40
codegen_flags: <defaults>
</compile_context>

<pallas_src>
import functools

import jax
import jax.numpy as jnp
from jax.experimental import pallas as pl
from jax.experimental.pallas import tpu as pltpu


# Tile targets sized so double-buffered tiles fit comfortably inside v7x's
# 32 MiB default scoped VMEM even at real PLIP shapes (256x3072 f32 activation
# tile + 3072x256 bf16 weight tile, 2x buffered, ~10 MiB total).
_TILE_M = 256
_TILE_N = 256


# ----------------------------- Pallas kernels ------------------------------

def _ln_matmul_kernel(x_ref, g_ref, b_ref, w_ref, bias_ref, o_ref, *, act):
    """out = act(LayerNorm(x) @ w + bias); LN in f32, matmul bf16 -> f32 acc."""
    x = x_ref[...]                                         # (tm, K) f32
    mu = jnp.mean(x, axis=-1, keepdims=True)
    var = jnp.mean(jnp.square(x - mu), axis=-1, keepdims=True)
    xn = (x - mu) * jax.lax.rsqrt(var + 1e-5) * g_ref[...] + b_ref[...]
    y = jnp.dot(xn.astype(jnp.bfloat16), w_ref[...],
                preferred_element_type=jnp.float32) + bias_ref[...]
    if act == "quick_gelu":                                # CLIP quick_gelu
        y = y * jax.nn.sigmoid(1.702 * y)
    o_ref[...] = y.astype(o_ref.dtype)


def _matmul_residual_kernel(x_ref, w_ref, bias_ref, res_ref, o_ref):
    """out = x @ w + bias + residual (x, w bf16; accumulate / add in f32)."""
    y = jnp.dot(x_ref[...], w_ref[...],
                preferred_element_type=jnp.float32) + bias_ref[...]
    o_ref[...] = (y + res_ref[...]).astype(o_ref.dtype)


def _matmul_nobias_kernel(x_ref, w_ref, o_ref):
    o_ref[...] = jnp.dot(x_ref[...].astype(jnp.bfloat16), w_ref[...],
                         preferred_element_type=jnp.float32).astype(o_ref.dtype)


def _layernorm_kernel(x_ref, g_ref, b_ref, o_ref):
    x = x_ref[...]
    mu = jnp.mean(x, axis=-1, keepdims=True)
    var = jnp.mean(jnp.square(x - mu), axis=-1, keepdims=True)
    o_ref[...] = ((x - mu) * jax.lax.rsqrt(var + 1e-5) * g_ref[...]
                  + b_ref[...]).astype(o_ref.dtype)


def _ln_project_l2norm_kernel(x_ref, g_ref, b_ref, w_ref, o_ref):
    """post_layernorm(CLS) -> visual_projection (no bias) -> L2 normalize."""
    x = x_ref[...]
    mu = jnp.mean(x, axis=-1, keepdims=True)
    var = jnp.mean(jnp.square(x - mu), axis=-1, keepdims=True)
    xn = (x - mu) * jax.lax.rsqrt(var + 1e-5) * g_ref[...] + b_ref[...]
    y = jnp.dot(xn.astype(jnp.bfloat16), w_ref[...],
                preferred_element_type=jnp.float32)
    o_ref[...] = y * jax.lax.rsqrt(jnp.sum(y * y, axis=-1, keepdims=True) + 1e-12)


def _flash_attn_kernel(q_ref, k_ref, v_ref, o_ref, m_sc, l_sc, acc_sc, *, scale):
    """Online-softmax attention; grid = (head blocks, q blocks, kv blocks)."""
    kv = pl.program_id(2)

    @pl.when(kv == 0)
    def _():
        m_sc[...] = jnp.full_like(m_sc, -jnp.inf)
        l_sc[...] = jnp.zeros_like(l_sc)
        acc_sc[...] = jnp.zeros_like(acc_sc)

    s = jnp.einsum("bqd,bkd->bqk", q_ref[...], k_ref[...],
                   preferred_element_type=jnp.float32) * scale
    m_new = jnp.maximum(m_sc[...], s.max(axis=-1, keepdims=True))
    alpha = jnp.exp(m_sc[...] - m_new)
    p = jnp.exp(s - m_new)
    l_sc[...] = alpha * l_sc[...] + p.sum(axis=-1, keepdims=True)
    acc_sc[...] = alpha * acc_sc[...] + jnp.einsum(
        "bqk,bkd->bqd", p.astype(jnp.bfloat16), v_ref[...],
        preferred_element_type=jnp.float32)
    m_sc[...] = m_new

    @pl.when(kv == pl.num_programs(2) - 1)
    def _():
        o_ref[...] = (acc_sc[...]
                      * pl.reciprocal(l_sc[...], approx=True)).astype(o_ref.dtype)


# ------------------------------ gridded wrappers ----------------------------

def _pick_row_tile(m, target=_TILE_M):
    """Return (tile_m, padded_m); tile is a multiple of 8 or the full dim."""
    if m <= target:
        return m, m
    if m % target == 0:
        return target, m
    return target, pl.cdiv(m, target) * target


def _pick_col_tile(n, target=_TILE_N):
    """128/256-lane dense column tile when it divides N, else full N."""
    if n > target and n % target == 0:
        return target
    return n


def _pad_rows(x, mp):
    m = x.shape[0]
    return x if mp == m else jnp.pad(x, ((0, mp - m), (0, 0)))


def fused_ln_matmul(x, g, b, w, bias, *, act=None, out_dtype=jnp.float32):
    M, K = x.shape
    N = w.shape[1]
    tm, Mp = _pick_row_tile(M)
    tn = _pick_col_tile(N)
    xp = _pad_rows(x, Mp)
    out = pl.pallas_call(
        functools.partial(_ln_matmul_kernel, act=act),
        out_shape=jax.ShapeDtypeStruct((Mp, N), out_dtype),
        grid=(Mp // tm, N // tn),
        in_specs=[
            pl.BlockSpec((tm, K), lambda i, j: (i, 0)),
            pl.BlockSpec((1, K), lambda i, j: (0, 0)),
            pl.BlockSpec((1, K), lambda i, j: (0, 0)),
            pl.BlockSpec((K, tn), lambda i, j: (0, j)),
            pl.BlockSpec((1, tn), lambda i, j: (0, j)),
        ],
        out_specs=pl.BlockSpec((tm, tn), lambda i, j: (i, j)),
        compiler_params=pltpu.CompilerParams(
            dimension_semantics=("parallel", "parallel")),
    )(xp, g, b, w, bias)
    return out[:M] if Mp != M else out


def matmul_residual(x, w, bias, res, *, out_dtype=jnp.float32):
    M, K = x.shape
    N = w.shape[1]
    tm, Mp = _pick_row_tile(M)
    tn = _pick_col_tile(N)
    xp = _pad_rows(x, Mp)
    rp = _pad_rows(res, Mp)
    out = pl.pallas_call(
        _matmul_residual_kernel,
        out_shape=jax.ShapeDtypeStruct((Mp, N), out_dtype),
        grid=(Mp // tm, N // tn),
        in_specs=[
            pl.BlockSpec((tm, K), lambda i, j: (i, 0)),
            pl.BlockSpec((K, tn), lambda i, j: (0, j)),
            pl.BlockSpec((1, tn), lambda i, j: (0, j)),
            pl.BlockSpec((tm, tn), lambda i, j: (i, j)),
        ],
        out_specs=pl.BlockSpec((tm, tn), lambda i, j: (i, j)),
        compiler_params=pltpu.CompilerParams(
            dimension_semantics=("parallel", "parallel")),
    )(xp, w, bias, rp)
    return out[:M] if Mp != M else out


def matmul_nobias(x, w, *, out_dtype=jnp.float32):
    M, K = x.shape
    N = w.shape[1]
    tm, Mp = _pick_row_tile(M)
    tn = _pick_col_tile(N)
    xp = _pad_rows(x, Mp)
    out = pl.pallas_call(
        _matmul_nobias_kernel,
        out_shape=jax.ShapeDtypeStruct((Mp, N), out_dtype),
        grid=(Mp // tm, N // tn),
        in_specs=[
            pl.BlockSpec((tm, K), lambda i, j: (i, 0)),
            pl.BlockSpec((K, tn), lambda i, j: (0, j)),
        ],
        out_specs=pl.BlockSpec((tm, tn), lambda i, j: (i, j)),
        compiler_params=pltpu.CompilerParams(
            dimension_semantics=("parallel", "parallel")),
    )(xp, w)
    return out[:M] if Mp != M else out


def layernorm(x, g, b):
    M, K = x.shape
    tm, Mp = _pick_row_tile(M)
    xp = _pad_rows(x, Mp)
    out = pl.pallas_call(
        _layernorm_kernel,
        out_shape=jax.ShapeDtypeStruct((Mp, K), jnp.float32),
        grid=(Mp // tm,),
        in_specs=[
            pl.BlockSpec((tm, K), lambda i: (i, 0)),
            pl.BlockSpec((1, K), lambda i: (0, 0)),
            pl.BlockSpec((1, K), lambda i: (0, 0)),
        ],
        out_specs=pl.BlockSpec((tm, K), lambda i: (i, 0)),
        compiler_params=pltpu.CompilerParams(dimension_semantics=("parallel",)),
    )(xp, g, b)
    return out[:M] if Mp != M else out


def ln_project_l2norm(x, g, b, w):
    M, K = x.shape
    N = w.shape[1]
    tm, Mp = _pick_row_tile(M)
    xp = _pad_rows(x, Mp)
    out = pl.pallas_call(
        _ln_project_l2norm_kernel,
        out_shape=jax.ShapeDtypeStruct((Mp, N), jnp.float32),
        grid=(Mp // tm,),
        in_specs=[
            pl.BlockSpec((tm, K), lambda i: (i, 0)),
            pl.BlockSpec((1, K), lambda i: (0, 0)),
            pl.BlockSpec((1, K), lambda i: (0, 0)),
            pl.BlockSpec((K, N), lambda i: (0, 0)),
        ],
        out_specs=pl.BlockSpec((tm, N), lambda i: (i, 0)),
        compiler_params=pltpu.CompilerParams(dimension_semantics=("parallel",)),
    )(xp, g, b, w)
    return out[:M] if Mp != M else out


def flash_attention(q, k, v, *, scale):
    """q, k, v: (B*nh, S, dh) bf16 -> (B*nh, S, dh) bf16."""
    BH, S, dh = q.shape
    hb = 1
    for cand in (8, 4, 2, 1):
        if BH % cand == 0:
            hb = cand
            break
    tq = 128 if (S > 128 and S % 128 == 0) else S
    tk = 128 if (S > 128 and S % 128 == 0) else S
    # TODO(synk): pack 2 heads per 128-lane block when dh < 128 for lane-dense stores.
    return pl.pallas_call(
        functools.partial(_flash_attn_kernel, scale=scale),
        out_shape=jax.ShapeDtypeStruct((BH, S, dh), jnp.bfloat16),
        grid=(BH // hb, S // tq, S // tk),
        in_specs=[
            pl.BlockSpec((hb, tq, dh), lambda b, i, j: (b, i, 0)),
            pl.BlockSpec((hb, tk, dh), lambda b, i, j: (b, j, 0)),
            pl.BlockSpec((hb, tk, dh), lambda b, i, j: (b, j, 0)),
        ],
        out_specs=pl.BlockSpec((hb, tq, dh), lambda b, i, j: (b, i, 0)),
        scratch_shapes=[
            pltpu.VMEM((hb, tq, 1), jnp.float32),   # running max m
            pltpu.VMEM((hb, tq, 1), jnp.float32),   # running denom l
            pltpu.VMEM((hb, tq, dh), jnp.float32),  # output accumulator
        ],
        compiler_params=pltpu.CompilerParams(
            dimension_semantics=("parallel", "parallel", "arbitrary")),
    )(q, k, v)


# ------------------------------- model glue ---------------------------------

def init_params(key, cfg):
    C, p, D = cfg["channels"], cfg["patch"], cfg["hidden"]
    I, P = cfg["intermediate"], cfg["proj"]
    S = (cfg["image"] // p) ** 2 + 1

    def nrm(k, shape, scale=0.02):
        return scale * jax.random.normal(k, shape, dtype=jnp.float32)

    keys = iter(jax.random.split(key, 8 + 16 * cfg["layers"]))
    params = {
        # MXU weights stored in bf16; f32 accumulation happens in-kernel.
        "patch_w": nrm(next(keys), (C * p * p, D)).astype(jnp.bfloat16),
        "class_emb": nrm(next(keys), (D,)),
        "pos_emb": nrm(next(keys), (S, D)),
        "pre_ln_g": jnp.ones((1, D), jnp.float32),
        "pre_ln_b": jnp.zeros((1, D), jnp.float32),
        "post_ln_g": jnp.ones((1, D), jnp.float32),
        "post_ln_b": jnp.zeros((1, D), jnp.float32),
        "proj_w": nrm(next(keys), (D, P)).astype(jnp.bfloat16),
        "layers": [],
    }
    for _ in range(cfg["layers"]):
        qw, qb = nrm(next(keys), (D, D)), nrm(next(keys), (1, D))
        kw, kb = nrm(next(keys), (D, D)), nrm(next(keys), (1, D))
        vw, vb = nrm(next(keys), (D, D)), nrm(next(keys), (1, D))
        layer = {
            "ln1_g": jnp.ones((1, D), jnp.float32),
            "ln1_b": jnp.zeros((1, D), jnp.float32),
            # fused QKV projection: one (D, 3D) matmul instead of three.
            "qkv_w": jnp.concatenate([qw, kw, vw], axis=1).astype(jnp.bfloat16),
            "qkv_b": jnp.concatenate([qb, kb, vb], axis=1),
            "o_w": nrm(next(keys), (D, D)).astype(jnp.bfloat16),
            "o_b": nrm(next(keys), (1, D)),
            "ln2_g": jnp.ones((1, D), jnp.float32),
            "ln2_b": jnp.zeros((1, D), jnp.float32),
            "fc1_w": nrm(next(keys), (D, I)).astype(jnp.bfloat16),
            "fc1_b": nrm(next(keys), (1, I)),
            "fc2_w": nrm(next(keys), (I, D)).astype(jnp.bfloat16),
            "fc2_b": nrm(next(keys), (1, D)),
        }
        params["layers"].append(layer)
    return params


def plip_backbone_forward(x, params, cfg):
    """x: NCHW float32. Returns L2-normalized projected features (B, proj_dim)."""
    B, C, H, W = x.shape
    p, D, nh = cfg["patch"], cfg["hidden"], cfg["heads"]
    dh = D // nh
    gh, gw = H // p, W // p
    n_patches = gh * gw

    # Patchify NCHW; each patch flattened (C, p, p) row-major to match the
    # PyTorch conv weight .reshape(D, C*p*p) semantics.
    patches = (
        x.reshape(B, C, gh, p, gw, p)
        .transpose(0, 2, 4, 1, 3, 5)
        .reshape(B * n_patches, C * p * p)
    )
    patch_emb = matmul_nobias(patches, params["patch_w"]).reshape(B, n_patches, D)

    cls = jnp.broadcast_to(params["class_emb"][None, None, :], (B, 1, D))
    h = jnp.concatenate([cls, patch_emb], axis=1) + params["pos_emb"][None, :, :]
    S = h.shape[1]
    h = h.reshape(B * S, D)

    # CLIP vision pre_layrnorm
    h = layernorm(h, params["pre_ln_g"], params["pre_ln_b"])

    def split_heads(t):  # (B*S, D) -> (B*nh, S, dh)
        return (t.reshape(B, S, nh, dh).transpose(0, 2, 1, 3)
                .reshape(B * nh, S, dh))

    for layer in params["layers"]:
        # --- self-attention: fused LN1+QKV, flash attention, o-proj+residual ---
        qkv = fused_ln_matmul(h, layer["ln1_g"], layer["ln1_b"],
                              layer["qkv_w"], layer["qkv_b"],
                              out_dtype=jnp.bfloat16)            # (B*S, 3D) bf16
        q = split_heads(qkv[:, :D])
        k = split_heads(qkv[:, D:2 * D])
        v = split_heads(qkv[:, 2 * D:])
        attn = flash_attention(q, k, v, scale=dh ** -0.5)        # (B*nh, S, dh)
        attn = (attn.reshape(B, nh, S, dh).transpose(0, 2, 1, 3)
                .reshape(B * S, D))
        h = matmul_residual(attn, layer["o_w"], layer["o_b"], h)  # + residual

        # --- MLP: fused LN2+fc1+quick_gelu, fused fc2+residual ---
        m = fused_ln_matmul(h, layer["ln2_g"], layer["ln2_b"],
                            layer["fc1_w"], layer["fc1_b"],
                            act="quick_gelu", out_dtype=jnp.bfloat16)
        h = matmul_residual(m, layer["fc2_w"], layer["fc2_b"], h)

    h = h.reshape(B, S, D)
    # pooled = post_layernorm(CLS) -> visual_projection -> L2 normalize (one kernel).
    feats = ln_project_l2norm(h[:, 0, :], params["post_ln_g"],
                              params["post_ln_b"], params["proj_w"])
    return feats


if __name__ == "__main__":
    cfg = dict(
        image=16, patch=8, channels=3,
        hidden=32, heads=2, intermediate=64, layers=2, proj=16,
    )
    key = jax.random.PRNGKey(0)
    pkey, xkey = jax.random.split(key)
    params = init_params(pkey, cfg)

    x = jax.random.normal(xkey, (2, cfg["channels"], cfg["image"], cfg["image"]),
                          dtype=jnp.float32)  # NCHW, like PyTorch

    feats = jax.block_until_ready(plip_backbone_forward(x, params, cfg))

    # sanity: outputs are unit-norm, shape (B, proj_dim)
    assert feats.shape == (2, cfg["proj"])
    norms = jnp.linalg.norm(feats, axis=-1)
    assert bool(jnp.all(jnp.abs(norms - 1.0) < 1e-3))

    print("KERNEL_OK")
</pallas_src>

<mosaic_0001>
module attributes {stable_mosaic.version = 11 : i64} {
  func.func @_matmul_nobias_kernel(%arg0: i32, %arg1: i32, %arg2: memref<8x192xf32, #tpu.memory_space<vmem>>, %arg3: memref<192x32xbf16, #tpu.memory_space<vmem>>, %arg4: memref<8x32xf32, #tpu.memory_space<vmem>>) attributes {dimension_semantics = [#tpu.dimension_semantics<parallel>, #tpu.dimension_semantics<parallel>], iteration_bounds = array<i64: 1, 1>, scalar_prefetch = 0 : i64, scratch_operands = 0 : i64, tpu.core_type = #tpu.core_type<tc>, window_params = [{transform_indices = @transform_0, window_bounds = array<i64: 8, 192>}, {transform_indices = @transform_1, window_bounds = array<i64: 192, 32>}, {transform_indices = @transform_2, window_bounds = array<i64: 8, 32>}]} {
    %c0 = arith.constant 0 : index
    %c0_0 = arith.constant 0 : index
    %0 = vector.load %arg2[%c0, %c0_0] : memref<8x192xf32, #tpu.memory_space<vmem>>, vector<8x192xf32>
    %1 = arith.truncf %0 : vector<8x192xf32> to vector<8x192xbf16>
    %c0_1 = arith.constant 0 : index
    %c0_2 = arith.constant 0 : index
    %2 = vector.load %arg3[%c0_1, %c0_2] : memref<192x32xbf16, #tpu.memory_space<vmem>>, vector<192x32xbf16>
    %cst = arith.constant dense<0.000000e+00> : vector<8x32xf32>
    %3 = tpu.matmul %1, %2, %cst {dimension_numbers = #tpu.dot_dimension_numbers<[1], [0], [0], [1], [0, 0, 1, 1], [], []>} : vector<8x192xbf16>, vector<192x32xbf16>, vector<8x32xf32> -> vector<8x32xf32>
    %c0_3 = arith.constant 0 : index
    %c0_4 = arith.constant 0 : index
    %4 = vector.load %arg4[%c0_3, %c0_4] : memref<8x32xf32, #tpu.memory_space<vmem>>, vector<8x32xf32>
    tpu.vector_store %arg4[%c0_3, %c0_4], %3 {strides = array<i32>} : memref<8x32xf32, #tpu.memory_space<vmem>>, vector<8x32xf32>,
    return
  }
  func.func @transform_0(%arg0: i32, %arg1: i32) -> (i32, i32) {
    %c0_i32 = arith.constant 0 : i32
    %c0_i32_0 = arith.constant 0 : i32
    return %arg0, %c0_i32 : i32, i32
  }
  func.func @transform_1(%arg0: i32, %arg1: i32) -> (i32, i32) {
    %c0_i32 = arith.constant 0 : i32
    %c0_i32_0 = arith.constant 0 : i32
    return %c0_i32, %arg1 : i32, i32
  }
  func.func @transform_2(%arg0: i32, %arg1: i32) -> (i32, i32) {
    %c0_i32 = arith.constant 0 : i32
    return %arg0, %arg1 : i32, i32
  }
}

</mosaic_0001>

<bundles_post_ra>
// kernel: tpu_custom_call.1
= control target key start
LH: loop header
LB: loop body
LE: loop exit
PB: predicated region body
PF: predicated region fallthrough
CT: control target
= control target key end

     0   :  { %v222_v1 = vmov 0   ;;  %vm113_vm0 = vcmask 523264   ;;  %s284_s0 = inlined_call_operand.vmem [shape: f32[8,192], index: 0, kind: input, shape index: {}]   ;;  %s285_s1 = inlined_call_operand.vmem [shape: bf16[192,32], index: 1, kind: input, shape index: {}]   ;;  %s286_s2 = inlined_call_operand.hbm [shape: f32[8,32], index: 2, kind: output, shape index: {}]  }
   0x1   :  { %v188_v0 = vld [vmem:[%s285_s1 + $0x38] sm:$0xff]   ;;  %117 = vmatprep.subr.bf16.mxu0 %v222_v1  ;;  %v189_v2 = vld [vmem:[%s285_s1 + $0x30] sm:$0xff]   ;;  %v190_v3 = vld [vmem:[%s285_s1 + $0x28] sm:$0xff]  }
   0x2   :  { %118 = vmatpush1.bf16.msra.mxu0 %v188_v0  ;;  %v191_v4 = vld [vmem:[%s285_s1 + $0x20] sm:$0xff]   ;;  %v14_v5 = vld [vmem:[%s284_s0 + $0x8] sm:$0xff] }
   0x3   :  { %119 = vmatprep.subr.bf16.mxu0 %v222_v1 }
   0x6   :  { %120 = vmatpush1.bf16.msra.mxu0 %v189_v2 }
   0x7   :  { %121 = vmatprep.subr.bf16.mxu0 %v222_v1 }
   0xa   :  { %122 = vmatpush1.bf16.msra.mxu0 %v190_v3 }
   0xb   :  { %123 = vmatprep.subr.bf16.mxu0 %v222_v1 }
   0xc   :  { %7 = vsyncpa [#allocation3], 0  ;;  %v16_v6 = vpack.c.bf16 %v14_v5, %v14_v5  ;;  %v192_v7 = vld [vmem:[%s285_s1 + $0x18] sm:$0xff]   ;;  %v193_v8 = vld [vmem:[%s285_s1 + $0x10] sm:$0xff]   ;;  %s223_s9 = smov [#allocation2]   ;;  %vm157_vm1 = vcmask 261120  }
   0xd   :  { %v194_v9 = vld [vmem:[%s285_s1 + $0x8] sm:$0xff]   ;;  %v195_v10 = vld [vmem:[%s285_s1] sm:$0xff]   ;;  %v196_v11 = vld [vmem:[%s285_s1 + $0x58] sm:$0xff]   ;;  %s165_s10 = sshll.u32 %s223_s9, 4  ;;  %s166_s10 = int_to_ptr.vmem [resolvable:$true] %s165_s10 }
   0xe   :  { %124 = vmatpush1.bf16.msra.mxu0 %v191_v4  ;;  %185 = vmatprep.mubr.msk.bf16.mxu0 %vm113_vm0, %v16_v6  ;;  %v197_v12 = vld [vmem:[%s285_s1 + $0x50] sm:$0xff]   ;;  %v198_v13 = vld [vmem:[%s285_s1 + $0x48] sm:$0xff]   ;;  %v199_v14 = vld [vmem:[%s285_s1 + $0x40] sm:$0xff]   ;;  %s200_s11 = scalar_lea.vmem %s166_s10, 128  ;;  %p205_p1 = scmp.lt.s32.totalorder %s166_s10, %s166_s10 }
   0xf   :  { %125 = vmatprep.subr.bf16.mxu0 %v222_v1  ;;  %v13_v15 = vld [vmem:[%s284_s0] sm:$0xff]  ;;  %p201_p0 = scmp.ne.s32.totalorder %s166_s10, %s200_s11  ;;  %p206_p2 = scmp.lt.s32.totalorder %s200_s11, %s200_s11 }
  0x10   :  { %v15_v16 = vpack.c.bf16 %v13_v15, %v13_v15 }
  0x11   :  { %p207_p3 = por %p206_p2, %p205_p1 }
  0x12   :  { %126 = vmatpush1.bf16.msra.mxu0 %v192_v7 }
  0x13   :  { %127 = vmatprep.subr.bf16.mxu0 %v222_v1  ;;  %p208_p4 = pnand %p207_p3, %p201_p0 }
  0x16   :  { %128 = vmatpush1.bf16.msra.mxu0 %v193_v8 }
  0x17   :  { %129 = vmatprep.subr.bf16.mxu0 %v222_v1 }
  0x1a   :  { %130 = vmatpush1.bf16.msra.mxu0 %v194_v9 }
  0x1b   :  { %131 = vmatprep.subr.bf16.mxu0 %v222_v1 }
  0x1e   :  { %132 = vmatpush1.bf16.msra.mxu0 %v195_v10 }
  0x1f   :  { %141 = vmatprep.subr.bf16.mxu0 %v222_v1 }
  0x22   :  { %142 = vmatpush2.bf16.msra.mxu0 %v196_v11 }
  0x23   :  { %143 = vmatprep.subr.bf16.mxu0 %v222_v1 }
  0x26   :  { %144 = vmatpush2.bf16.msra.mxu0 %v197_v12 }
  0x27   :  { %145 = vmatprep.subr.bf16.mxu0 %v222_v1 }
  0x2a   :  { %146 = vmatpush2.bf16.msra.mxu0 %v198_v13 }
  0x2b   :  { %147 = vmatprep.subr.bf16.mxu0 %v222_v1 }
  0x2e   :  { %148 = vmatpush2.bf16.msra.mxu0 %v199_v14 }
  0x31   :  { %150 = vmatmul.mubr.bf16.vlgmr.msra.gmra.mxu0 %v15_v16 }
  0xf1   :  { %v151_v17 = vpop.f32.mrf.mxu0 }
  0xf2   :  { %158 = vst.msk [vmem:[#allocation2] sm:$0xff] %vm157_vm1, %v151_v17 }
  0xf3   :  { %v153_v18 = vpop.f32.mrf.mxu0 }
  0xf4   :  { %211 = shalt.err (!%p208_p4)
}
  0xf5   :  { %168 = dma.vmem_to_hbm [thread:$0]  %s166_s10, 128, %s286_s2, [#allocation3]   ;;  %v154_v19 = vpop.f32.mrf.mxu0 }
  0xf7   :  { %v155_v20 = vpop.f32.mrf.mxu0 }
  0xf8   :  { %220 = dma.done.wait [#allocation3], 128  }
  0xf9   :  { %221 = vsyncadd [#allocation3], 4294967168 }
  0xfa   :  { %172 = vsyncpa [#allocation3], 1 }

</bundles_post_ra>
